<compile_context>
chip_gen: v7x
topology: tpu7x:2x2x1
jax: 0.10.0
libtpu: 0.0.40
codegen_flags: <defaults>
</compile_context>

<pallas_src>
import functools

import jax
import jax.numpy as jnp
from jax import lax
from jax.experimental import pallas as pl
from jax.experimental.pallas import tpu as pltpu


def _round_up(x, m):
    return ((x + m - 1) // m) * m


def dan_kernel(data_ref, mask_ref, a_ref, bm_ref, b1_ref,
               w2_ref, b2_ref, wp_ref, bp_ref, out_ref, acc_ref):
    v_idx = pl.program_id(1)

    # --- init accumulator on first vocab tile ---
    @pl.when(v_idx == 0)
    def _():
        acc_ref[...] = jnp.zeros_like(acc_ref)

    # --- masked token ids (int32, VPU) ---
    ids = data_ref[...] * mask_ref[...]                       # (TILE_B, S) int32
    tile_b, seq = ids.shape
    tile_v = a_ref.shape[0]
    param_dtype = a_ref.dtype

    # global vocab ids covered by this V tile
    lane_iota = (lax.broadcasted_iota(jnp.int32, (tile_b, tile_v), 1)
                 + v_idx * tile_v)                            # (TILE_B, TILE_V)

    # first token ("word") one-hot within this V tile
    oh_word = (ids[:, 0:1] == lane_iota).astype(param_dtype)  # (TILE_B, TILE_V)

    # sentence token counts within this V tile: int32 accumulation, single cast.
    counts = (ids[:, 1:2] == lane_iota).astype(jnp.int32)
    for s in range(2, seq):                                   # short static unroll
        counts = counts + (ids[:, s:s + 1] == lane_iota).astype(jnp.int32)
    counts_f = counts.astype(param_dtype)                     # mean scale folded into Bm

    # --- partial first-layer pre-activation for this V tile (MXU) ---
    acc_ref[...] += (
        jnp.dot(oh_word, a_ref[...], preferred_element_type=jnp.float32)
        + jnp.dot(counts_f, bm_ref[...], preferred_element_type=jnp.float32))

    # --- finalize on last vocab tile: bias+ReLU, second layer, projection ---
    @pl.when(v_idx == pl.num_programs(1) - 1)
    def _():
        h = jnp.maximum(acc_ref[...] + b1_ref[...], 0.0)                 # (TILE_B, D1) f32
        h = jnp.maximum(
            jnp.dot(h.astype(w2_ref.dtype), w2_ref[...],
                    preferred_element_type=jnp.float32) + b2_ref[...], 0.0)
        out_ref[...] = (
            jnp.dot(h.astype(wp_ref.dtype), wp_ref[...],
                    preferred_element_type=jnp.float32) + bp_ref[...]
        ).astype(out_ref.dtype)


@functools.partial(jax.jit, static_argnames=("tile_b", "tile_v", "param_dtype"))
def dan_forward(data, mask, emb, w1, b1, w2, b2, wp, bp,
                *, tile_b=None, tile_v=None, param_dtype=jnp.float32):
    """data, mask: (B, S) int32. Weights are stored as (in, out) (transpose of torch)."""
    B, S = data.shape
    assert S >= 2, "need at least one 'word' token and one sentence token"
    V, E = emb.shape
    D1 = w1.shape[1]
    D2 = w2.shape[1]
    C = wp.shape[1]

    # ---- tile selection ----
    if tile_b is None:
        tile_b = min(128, _round_up(B, 8))        # 128-row LHS feeds the MXU well
    if tile_v is None:
        tile_v = min(512, _round_up(V, 8))        # bound VMEM even for huge vocabs
    B_pad = _round_up(B, tile_b)
    V_pad = _round_up(V, tile_v)
    C_pad = _round_up(max(C, 128), 128)           # lane-dense output stores

    # ---- wrapper-side weight folding (one-time cost) ----
    # word path / mean path of the first dense layer, mean scale folded in.
    A = (emb @ w1[:E, :]).astype(param_dtype)                    # (V, D1)
    Bm = ((emb @ w1[E:, :]) * (1.0 / (S - 1))).astype(param_dtype)

    if V_pad != V:
        A = jnp.pad(A, ((0, V_pad - V), (0, 0)))
        Bm = jnp.pad(Bm, ((0, V_pad - V), (0, 0)))
    if B_pad != B:
        data = jnp.pad(data, ((0, B_pad - B), (0, 0)))
        mask = jnp.pad(mask, ((0, B_pad - B), (0, 0)))

    w2c = w2.astype(param_dtype)
    wp_p = jnp.pad(wp.astype(param_dtype), ((0, 0), (0, C_pad - C)))
    b1f = b1.astype(jnp.float32)
    b2f = b2.astype(jnp.float32)
    bp_p = jnp.pad(bp.astype(jnp.float32), ((0, 0), (0, C_pad - C)))

    grid = (B_pad // tile_b, V_pad // tile_v)

    out = pl.pallas_call(
        dan_kernel,
        out_shape=jax.ShapeDtypeStruct((B_pad, C_pad), jnp.float32),
        grid=grid,
        in_specs=[
            pl.BlockSpec((tile_b, S), lambda i, v: (i, 0)),       # data
            pl.BlockSpec((tile_b, S), lambda i, v: (i, 0)),       # mask
            pl.BlockSpec((tile_v, D1), lambda i, v: (v, 0)),      # A  (V-tiled)
            pl.BlockSpec((tile_v, D1), lambda i, v: (v, 0)),      # Bm (V-tiled)
            pl.BlockSpec((1, D1), lambda i, v: (0, 0)),           # b1
            pl.BlockSpec((D1, D2), lambda i, v: (0, 0)),          # w2
            pl.BlockSpec((1, D2), lambda i, v: (0, 0)),           # b2
            pl.BlockSpec((D2, C_pad), lambda i, v: (0, 0)),       # wp (lane-padded)
            pl.BlockSpec((1, C_pad), lambda i, v: (0, 0)),        # bp (lane-padded)
        ],
        out_specs=pl.BlockSpec((tile_b, C_pad), lambda i, v: (i, 0)),
        scratch_shapes=[pltpu.VMEM((tile_b, D1), jnp.float32)],
        compiler_params=pltpu.CompilerParams(
            dimension_semantics=("parallel", "arbitrary")),
    )(data, mask, A, Bm, b1f, w2c, b2f, wp_p, bp_p)

    return out[:B, :C]


def reference(data, mask, emb, w1, b1, w2, b2, wp, bp):
    """Plain-JAX mirror of the PyTorch forward (eval mode)."""
    ids = data * mask
    e = emb[ids]                                  # (B, S, E)
    word = e[:, 0, :]
    avg = jnp.mean(e[:, 1:, :], axis=1)
    x = jnp.concatenate([word, avg], axis=1)
    h = jax.nn.relu(x @ w1 + b1)
    h = jax.nn.relu(h @ w2 + b2)
    return h @ wp + bp


if __name__ == "__main__":
    # Small shapes consistent with the module (word token + sentence tokens).
    B, S = 4, 8                   # batch, sequence length
    V, E = 32, 32                 # emb_input_dim (vocab), emb_output_dim
    D1, D2 = 64, 64               # dense_units
    C = 2                         # num_classes

    key = jax.random.PRNGKey(0)
    k_ids, k_mask, k_emb, k_w1, k_b1, k_w2, k_b2, k_wp, k_bp = jax.random.split(key, 9)

    data = jax.random.randint(k_ids, (B, S), 0, V, dtype=jnp.int32)
    mask = jax.random.randint(k_mask, (B, S), 0, 2, dtype=jnp.int32)

    emb = jax.random.normal(k_emb, (V, E), jnp.float32) * 0.1
    w1 = jax.random.normal(k_w1, (2 * E, D1), jnp.float32) * 0.1
    b1 = jax.random.normal(k_b1, (1, D1), jnp.float32) * 0.1
    w2 = jax.random.normal(k_w2, (D1, D2), jnp.float32) * 0.1
    b2 = jax.random.normal(k_b2, (1, D2), jnp.float32) * 0.1
    wp = jax.random.normal(k_wp, (D2, C), jnp.float32) * 0.1
    bp = jax.random.normal(k_bp, (1, C), jnp.float32) * 0.1

    out = dan_forward(data, mask, emb, w1, b1, w2, b2, wp, bp)
    out = jax.block_until_ready(out)

    ref = reference(data, mask, emb, w1, b1, w2, b2, wp, bp)
    assert out.shape == (B, C)
    assert jnp.allclose(out, ref, atol=1e-4, rtol=1e-4), (out, ref)

    print("KERNEL_OK")
</pallas_src>

<mosaic_0001>
module attributes {stable_mosaic.version = 11 : i64} {
  func.func @dan_kernel(%arg0: i32, %arg1: i32, %arg2: memref<8x8xi32, #tpu.memory_space<vmem>>, %arg3: memref<8x8xi32, #tpu.memory_space<vmem>>, %arg4: memref<32x64xf32, #tpu.memory_space<vmem>>, %arg5: memref<32x64xf32, #tpu.memory_space<vmem>>, %arg6: memref<1x64xf32, #tpu.memory_space<vmem>>, %arg7: memref<64x64xf32, #tpu.memory_space<vmem>>, %arg8: memref<1x64xf32, #tpu.memory_space<vmem>>, %arg9: memref<64x128xf32, #tpu.memory_space<vmem>>, %arg10: memref<1x128xf32, #tpu.memory_space<vmem>>, %arg11: memref<8x128xf32, #tpu.memory_space<vmem>>, %arg12: memref<8x64xf32, #tpu.memory_space<vmem>>) attributes {dimension_semantics = [#tpu.dimension_semantics<parallel>, #tpu.dimension_semantics<arbitrary>], iteration_bounds = array<i64: 1, 1>, scalar_prefetch = 0 : i64, scratch_operands = 1 : i64, tpu.core_type = #tpu.core_type<tc>, window_params = [{transform_indices = @transform_0, window_bounds = array<i64: 8, 8>}, {transform_indices = @transform_1, window_bounds = array<i64: 8, 8>}, {transform_indices = @transform_2, window_bounds = array<i64: 32, 64>}, {transform_indices = @transform_3, window_bounds = array<i64: 32, 64>}, {pipeline_mode = #tpu.pipeline_mode<synchronous>, transform_indices = @transform_4, window_bounds = array<i64: 1, 64>}, {pipeline_mode = #tpu.pipeline_mode<synchronous>, transform_indices = @transform_5, window_bounds = array<i64: 64, 64>}, {pipeline_mode = #tpu.pipeline_mode<synchronous>, transform_indices = @transform_6, window_bounds = array<i64: 1, 64>}, {pipeline_mode = #tpu.pipeline_mode<synchronous>, transform_indices = @transform_7, window_bounds = array<i64: 64, 128>}, {pipeline_mode = #tpu.pipeline_mode<synchronous>, transform_indices = @transform_8, window_bounds = array<i64: 1, 128>}, {transform_indices = @transform_9, window_bounds = array<i64: 8, 128>}]} {
    %c0_i32 = arith.constant 0 : i32
    %0 = arith.cmpi eq, %arg1, %c0_i32 : i32
    %1 = arith.extui %0 : i1 to i32
    %c0_i32_0 = arith.constant 0 : i32
    %2 = arith.cmpi ne, %1, %c0_i32_0 : i32
    scf.if %2 {
      %cst_15 = arith.constant 0.000000e+00 : f32
      %61 = vector.broadcast %cst_15 : f32 to vector<8x64xf32>
      %c0_16 = arith.constant 0 : index
      %c0_17 = arith.constant 0 : index
      %62 = vector.load %arg12[%c0_16, %c0_17] : memref<8x64xf32, #tpu.memory_space<vmem>>, vector<8x64xf32>
      tpu.vector_store %arg12[%c0_16, %c0_17], %61 {strides = array<i32>} : memref<8x64xf32, #tpu.memory_space<vmem>>, vector<8x64xf32>,
    } else {
    }
    %c0 = arith.constant 0 : index
    %c0_1 = arith.constant 0 : index
    %3 = vector.load %arg2[%c0, %c0_1] : memref<8x8xi32, #tpu.memory_space<vmem>>, vector<8x8xi32>
    %c0_2 = arith.constant 0 : index
    %c0_3 = arith.constant 0 : index
    %4 = vector.load %arg3[%c0_2, %c0_3] : memref<8x8xi32, #tpu.memory_space<vmem>>, vector<8x8xi32>
    %5 = arith.muli %3, %4 : vector<8x8xi32>
    %6 = tpu.iota {dimensions = array<i32: 1>} : vector<8x32xi32>
    %c32_i32 = arith.constant 32 : i32
    %7 = arith.muli %arg1, %c32_i32 : i32
    %8 = vector.broadcast %7 : i32 to vector<8x32xi32>
    %9 = arith.addi %6, %8 : vector<8x32xi32>
    %10 = vector.extract_strided_slice %5 {offsets = [0, 0], sizes = [8, 1], strides = [1, 1]} : vector<8x8xi32> to vector<8x1xi32>
    %11 = vector.broadcast %10 : vector<8x1xi32> to vector<8x32xi32>
    %12 = arith.cmpi eq, %11, %9 : vector<8x32xi32>
    %13 = arith.extui %12 : vector<8x32xi1> to vector<8x32xi32>
    %14 = arith.sitofp %13 : vector<8x32xi32> to vector<8x32xf32>
    %15 = vector.extract_strided_slice %5 {offsets = [0, 1], sizes = [8, 1], strides = [1, 1]} : vector<8x8xi32> to vector<8x1xi32>
    %16 = vector.broadcast %15 : vector<8x1xi32> to vector<8x32xi32>
    %17 = arith.cmpi eq, %16, %9 : vector<8x32xi32>
    %18 = arith.extui %17 : vector<8x32xi1> to vector<8x32xi32>
    %19 = vector.extract_strided_slice %5 {offsets = [0, 2], sizes = [8, 1], strides = [1, 1]} : vector<8x8xi32> to vector<8x1xi32>
    %20 = vector.broadcast %19 : vector<8x1xi32> to vector<8x32xi32>
    %21 = arith.cmpi eq, %20, %9 : vector<8x32xi32>
    %22 = arith.extui %21 : vector<8x32xi1> to vector<8x32xi32>
    %23 = arith.addi %18, %22 : vector<8x32xi32>
    %24 = vector.extract_strided_slice %5 {offsets = [0, 3], sizes = [8, 1], strides = [1, 1]} : vector<8x8xi32> to vector<8x1xi32>
    %25 = vector.broadcast %24 : vector<8x1xi32> to vector<8x32xi32>
    %26 = arith.cmpi eq, %25, %9 : vector<8x32xi32>
    %27 = arith.extui %26 : vector<8x32xi1> to vector<8x32xi32>
    %28 = arith.addi %23, %27 : vector<8x32xi32>
    %29 = vector.extract_strided_slice %5 {offsets = [0, 4], sizes = [8, 1], strides = [1, 1]} : vector<8x8xi32> to vector<8x1xi32>
    %30 = vector.broadcast %29 : vector<8x1xi32> to vector<8x32xi32>
    %31 = arith.cmpi eq, %30, %9 : vector<8x32xi32>
    %32 = arith.extui %31 : vector<8x32xi1> to vector<8x32xi32>
    %33 = arith.addi %28, %32 : vector<8x32xi32>
    %34 = vector.extract_strided_slice %5 {offsets = [0, 5], sizes = [8, 1], strides = [1, 1]} : vector<8x8xi32> to vector<8x1xi32>
    %35 = vector.broadcast %34 : vector<8x1xi32> to vector<8x32xi32>
    %36 = arith.cmpi eq, %35, %9 : vector<8x32xi32>
    %37 = arith.extui %36 : vector<8x32xi1> to vector<8x32xi32>
    %38 = arith.addi %33, %37 : vector<8x32xi32>
    %39 = vector.extract_strided_slice %5 {offsets = [0, 6], sizes = [8, 1], strides = [1, 1]} : vector<8x8xi32> to vector<8x1xi32>
    %40 = vector.broadcast %39 : vector<8x1xi32> to vector<8x32xi32>
    %41 = arith.cmpi eq, %40, %9 : vector<8x32xi32>
    %42 = arith.extui %41 : vector<8x32xi1> to vector<8x32xi32>
    %43 = arith.addi %38, %42 : vector<8x32xi32>
    %44 = vector.extract_strided_slice %5 {offsets = [0, 7], sizes = [8, 1], strides = [1, 1]} : vector<8x8xi32> to vector<8x1xi32>
    %45 = vector.broadcast %44 : vector<8x1xi32> to vector<8x32xi32>
    %46 = arith.cmpi eq, %45, %9 : vector<8x32xi32>
    %47 = arith.extui %46 : vector<8x32xi1> to vector<8x32xi32>
    %48 = arith.addi %43, %47 : vector<8x32xi32>
    %49 = arith.sitofp %48 : vector<8x32xi32> to vector<8x32xf32>
    %c0_4 = arith.constant 0 : index
    %c0_5 = arith.constant 0 : index
    %50 = vector.load %arg12[%c0_4, %c0_5] : memref<8x64xf32, #tpu.memory_space<vmem>>, vector<8x64xf32>
    %c0_6 = arith.constant 0 : index
    %c0_7 = arith.constant 0 : index
    %51 = vector.load %arg4[%c0_6, %c0_7] : memref<32x64xf32, #tpu.memory_space<vmem>>, vector<32x64xf32>
    %cst = arith.constant dense<0.000000e+00> : vector<8x64xf32>
    %52 = tpu.matmul %14, %51, %cst {dimension_numbers = #tpu.dot_dimension_numbers<[1], [0], [0], [1], [0, 0, 1, 1], [], []>} : vector<8x32xf32>, vector<32x64xf32>, vector<8x64xf32> -> vector<8x64xf32>
    %c0_8 = arith.constant 0 : index
    %c0_9 = arith.constant 0 : index
    %53 = vector.load %arg5[%c0_8, %c0_9] : memref<32x64xf32, #tpu.memory_space<vmem>>, vector<32x64xf32>
    %cst_10 = arith.constant dense<0.000000e+00> : vector<8x64xf32>
    %54 = tpu.matmul %49, %53, %cst_10 {dimension_numbers = #tpu.dot_dimension_numbers<[1], [0], [0], [1], [0, 0, 1, 1], [], []>} : vector<8x32xf32>, vector<32x64xf32>, vector<8x64xf32> -> vector<8x64xf32>
    %55 = arith.addf %52, %54 : vector<8x64xf32>
    %56 = arith.addf %50, %55 : vector<8x64xf32>
    %c0_11 = arith.constant 0 : index
    %c0_12 = arith.constant 0 : index
    %57 = vector.load %arg12[%c0_11, %c0_12] : memref<8x64xf32, #tpu.memory_space<vmem>>, vector<8x64xf32>
    tpu.vector_store %arg12[%c0_11, %c0_12], %56 {strides = array<i32>} : memref<8x64xf32, #tpu.memory_space<vmem>>, vector<8x64xf32>,
    %c0_i32_13 = arith.constant 0 : i32
    %58 = arith.cmpi eq, %arg1, %c0_i32_13 : i32
    %59 = arith.extui %58 : i1 to i32
    %c0_i32_14 = arith.constant 0 : i32
    %60 = arith.cmpi ne, %59, %c0_i32_14 : i32
    scf.if %60 {
      %c0_15 = arith.constant 0 : index
      %c0_16 = arith.constant 0 : index
      %61 = vector.load %arg12[%c0_15, %c0_16] : memref<8x64xf32, #tpu.memory_space<vmem>>, vector<8x64xf32>
      %c0_17 = arith.constant 0 : index
      %c0_18 = arith.constant 0 : index
      %62 = vector.load %arg6[%c0_17, %c0_18] : memref<1x64xf32, #tpu.memory_space<vmem>>, vector<1x64xf32>
      %63 = vector.broadcast %62 : vector<1x64xf32> to vector<8x64xf32>
      %64 = arith.addf %61, %63 : vector<8x64xf32>
      %cst_19 = arith.constant 0.000000e+00 : f32
      %65 = vector.broadcast %cst_19 : f32 to vector<8x64xf32>
      %66 = arith.maximumf %64, %65 : vector<8x64xf32>
      %c0_20 = arith.constant 0 : index
      %c0_21 = arith.constant 0 : index
      %67 = vector.load %arg7[%c0_20, %c0_21] : memref<64x64xf32, #tpu.memory_space<vmem>>, vector<64x64xf32>
      %cst_22 = arith.constant dense<0.000000e+00> : vector<8x64xf32>
      %68 = tpu.matmul %66, %67, %cst_22 {dimension_numbers = #tpu.dot_dimension_numbers<[1], [0], [0], [1], [0, 0, 1, 1], [], []>} : vector<8x64xf32>, vector<64x64xf32>, vector<8x64xf32> -> vector<8x64xf32>
      %c0_23 = arith.constant 0 : index
      %c0_24 = arith.constant 0 : index
      %69 = vector.load %arg8[%c0_23, %c0_24] : memref<1x64xf32, #tpu.memory_space<vmem>>, vector<1x64xf32>
      %70 = vector.broadcast %69 : vector<1x64xf32> to vector<8x64xf32>
      %71 = arith.addf %68, %70 : vector<8x64xf32>
      %cst_25 = arith.constant 0.000000e+00 : f32
      %72 = vector.broadcast %cst_25 : f32 to vector<8x64xf32>
      %73 = arith.maximumf %71, %72 : vector<8x64xf32>
      %c0_26 = arith.constant 0 : index
      %c0_27 = arith.constant 0 : index
      %74 = vector.load %arg9[%c0_26, %c0_27] : memref<64x128xf32, #tpu.memory_space<vmem>>, vector<64x128xf32>
      %cst_28 = arith.constant dense<0.000000e+00> : vector<8x128xf32>
      %75 = tpu.matmul %73, %74, %cst_28 {dimension_numbers = #tpu.dot_dimension_numbers<[1], [0], [0], [1], [0, 0, 1, 1], [], []>} : vector<8x64xf32>, vector<64x128xf32>, vector<8x128xf32> -> vector<8x128xf32>
      %c0_29 = arith.constant 0 : index
      %c0_30 = arith.constant 0 : index
      %76 = vector.load %arg10[%c0_29, %c0_30] : memref<1x128xf32, #tpu.memory_space<vmem>>, vector<1x128xf32>
      %77 = vector.broadcast %76 : vector<1x128xf32> to vector<8x128xf32>
      %78 = arith.addf %75, %77 : vector<8x128xf32>
      %c0_31 = arith.constant 0 : index
      %c0_32 = arith.constant 0 : index
      %79 = vector.load %arg11[%c0_31, %c0_32] : memref<8x128xf32, #tpu.memory_space<vmem>>, vector<8x128xf32>
      tpu.vector_store %arg11[%c0_31, %c0_32], %78 {strides = array<i32>} : memref<8x128xf32, #tpu.memory_space<vmem>>, vector<8x128xf32>,
    } else {
    }
    return
  }
  func.func @transform_0(%arg0: i32, %arg1: i32) -> (i32, i32) {
    %c0_i32 = arith.constant 0 : i32
    %c0_i32_0 = arith.constant 0 : i32
    return %arg0, %c0_i32 : i32, i32
  }
  func.func @transform_1(%arg0: i32, %arg1: i32) -> (i32, i32) {
    %c0_i32 = arith.constant 0 : i32
    %c0_i32_0 = arith.constant 0 : i32
    return %arg0, %c0_i32 : i32, i32
  }
  func.func @transform_2(%arg0: i32, %arg1: i32) -> (i32, i32) {
    %c0_i32 = arith.constant 0 : i32
    %c0_i32_0 = arith.constant 0 : i32
    return %arg1, %c0_i32 : i32, i32
  }
  func.func @transform_3(%arg0: i32, %arg1: i32) -> (i32, i32) {
    %c0_i32 = arith.constant 0 : i32
    %c0_i32_0 = arith.constant 0 : i32
    return %arg1, %c0_i32 : i32, i32
  }
  func.func @transform_4(%arg0: i32, %arg1: i32) -> (i32, i32) {
    %c0_i32 = arith.constant 0 : i32
    %c0_i32_0 = arith.constant 0 : i32
    %c0_i32_1 = arith.constant 0 : i32
    return %c0_i32, %c0_i32_0 : i32, i32
  }
  func.func @transform_5(%arg0: i32, %arg1: i32) -> (i32, i32) {
    %c0_i32 = arith.constant 0 : i32
    %c0_i32_0 = arith.constant 0 : i32
    %c0_i32_1 = arith.constant 0 : i32
    return %c0_i32, %c0_i32_0 : i32, i32
  }
  func.func @transform_6(%arg0: i32, %arg1: i32) -> (i32, i32) {
    %c0_i32 = arith.constant 0 : i32
    %c0_i32_0 = arith.constant 0 : i32
    %c0_i32_1 = arith.constant 0 : i32
    return %c0_i32, %c0_i32_0 : i32, i32
  }
  func.func @transform_7(%arg0: i32, %arg1: i32) -> (i32, i32) {
    %c0_i32 = arith.constant 0 : i32
    %c0_i32_0 = arith.constant 0 : i32
    %c0_i32_1 = arith.constant 0 : i32
    return %c0_i32, %c0_i32_0 : i32, i32
  }
  func.func @transform_8(%arg0: i32, %arg1: i32) -> (i32, i32) {
    %c0_i32 = arith.constant 0 : i32
    %c0_i32_0 = arith.constant 0 : i32
    %c0_i32_1 = arith.constant 0 : i32
    return %c0_i32, %c0_i32_0 : i32, i32
  }
  func.func @transform_9(%arg0: i32, %arg1: i32) -> (i32, i32) {
    %c0_i32 = arith.constant 0 : i32
    %c0_i32_0 = arith.constant 0 : i32
    return %arg0, %c0_i32 : i32, i32
  }
}

</mosaic_0001>

<bundles_post_ra>
// kernel: dan_forward.1
= control target key start
LH: loop header
LB: loop body
LE: loop exit
PB: predicated region body
PF: predicated region fallthrough
CT: control target
= control target key end

     0   :  { %v600_v0 = vmov 3   ;;  %v601_v1 = vmov 1   ;;  %v602_v5 = vmov 4   ;;  %v603_v6 = vmov 2   ;;  %s771_s0 = inlined_call_operand.vmem [shape: s32[8,8], index: 0, kind: input, shape index: {}]   ;;  %s772_s1 = inlined_call_operand.vmem [shape: s32[8,8], index: 1, kind: input, shape index: {}]   ;;  %s773_s3 = inlined_call_operand.vmem [shape: f32[32,64], index: 3, kind: input, shape index: {}]   ;;  %s774_s2 = inlined_call_operand.vmem [shape: f32[32,64], index: 2, kind: input, shape index: {}]   ;;  %s775_s5 = inlined_call_operand.vmem [shape: f32[64,64], index: 5, kind: input, shape index: {}]   ;;  %s776_s7 = inlined_call_operand.vmem [shape: f32[64,128], index: 7, kind: input, shape index: {}]   ;;  %s777_s4 = inlined_call_operand.vmem [shape: f32[1,64], index: 4, kind: input, shape index: {}]   ;;  %s778_s6 = inlined_call_operand.vmem [shape: f32[1,64], index: 6, kind: input, shape index: {}]   ;;  %s779_s8 = inlined_call_operand.vmem [shape: f32[1,128], index: 8, kind: input, shape index: {}]   ;;  %s780_s9 = inlined_call_operand.vmem [shape: f32[8,128], index: 9, kind: output, shape index: {}]  }
   0x1   :  { %593 = vset.pattern.permute.xlu1 %v600_v0  ;;  %591 = vset.pattern.permute.xlu0 %v601_v1  ;;  %v38_v2 = vld [vmem:[%s771_s0] sm:$0xff]  ;;  %v604_v7 = vmov 5   ;;  %v605_v8 = vmov 6   ;;  %v100_v10 = vld [vmem:[%s773_s3 + $0x8] sm:$0xff]  ;;  %v606_v14 = vmov 0.0|0.0   ;;  %v607_v16 = vmov 7  }
   0x2   :  { %v39_v3 = vld [vmem:[%s772_s1] sm:$0xff]  ;;  %v96_v13 = vld [vmem:[%s774_s2 + $0x8] sm:$0xff]  ;;  %544 = vmatprep.subr.bf16.mxu0 %v606_v14  ;;  %550 = vmatprep.subr.bf16.mxu1 %v606_v14  ;;  %v101_v17 = vld [vmem:[%s773_s3 + $0x10] sm:$0xff]  ;;  %v608_v23 = vmov 0   ;;  %vm609_vm0 = vmmov 0   ;;  %v610_v24 = vmov 0.0   ;;  %v41_v25 = vlaneseq }
   0x3   :  { %v40_v4 = vmul.u32 %v39_v3, %v38_v2  ;;  %v99_v9 = vld [vmem:[%s773_s3] sm:$0xff]  ;;  %v102_v18 = vld [vmem:[%s773_s3 + $0x18] sm:$0xff]  ;;  %v97_v20 = vld [vmem:[%s774_s2 + $0x10] sm:$0xff]  ;;  %492 = vmatprep.mubr.msk.f32.mxu0 %vm609_vm0, %v610_v24  ;;  %503 = vmatprep.mubr.msk.f32.mxu1 %vm609_vm0, %v610_v24  ;;  %vm103_vm8 = vcmask 261120   ;;  %vm36_vm10 = vcmask 523264  }
   0x4   :  { %v545_v11 = vpack.c.bf16 %v100_v10, %v99_v9  ;;  %v95_v12 = vld [vmem:[%s774_s2] sm:$0xff]  ;;  %v548_v19 = vpack.c.bf16 %v102_v18, %v101_v17  ;;  %v98_v21 = vld [vmem:[%s774_s2 + $0x18] sm:$0xff]  ;;  %v42_v26 = vand.u32 127, %v41_v25  ;;  %37 = vst.msk [vmem:[#allocation2] sm:$0xff] %vm36_vm10, %v610_v24  ;;  %v267_v51 = vld [vmem:[%s775_s5 + $0x8] sm:$0xff] }
   0x5   :  { %64 = vperm.xlu1 %593, %v40_v4   ;;  %53 = vperm.xlu0 %591, %v40_v4   ;;  %v551_v15 = vpack.c.bf16 %v96_v13, %v95_v12  ;;  %v554_v22 = vpack.c.bf16 %v98_v21, %v97_v20  ;;  %v266_v50 = vld [vmem:[%s775_s5] sm:$0xff]  ;;  %v268_v53 = vld [vmem:[%s775_s5 + $0x10] sm:$0xff]  ;;  %v269_v54 = vld [vmem:[%s775_s5 + $0x18] sm:$0xff] }
   0x6   :  { %546 = vmatpush3.bf16.msra.mxu0 %v545_v11  ;;  %v557_v52 = vpack.c.bf16 %v267_v51, %v266_v50  ;;  %v560_v55 = vpack.c.bf16 %v269_v54, %v268_v53  ;;  %v270_v56 = vld [vmem:[%s775_s5 + $0x20] sm:$0xff]  ;;  %v271_v57 = vld [vmem:[%s775_s5 + $0x28] sm:$0xff]  ;;  %v272_v59 = vld [vmem:[%s775_s5 + $0x30] sm:$0xff] }
   0x7   :  { %552 = vmatpush3.bf16.msra.mxu1 %v551_v15  ;;  %547 = vmatprep.subr.bf16.mxu0 %v606_v14  ;;  %v563_v58 = vpack.c.bf16 %v271_v57, %v270_v56  ;;  %v273_v60 = vld [vmem:[%s775_s5 + $0x38] sm:$0xff]  ;;  %v355_v62 = vld [vmem:[%s776_s7] sm:$0xff]  ;;  %v356_v63 = vld [vmem:[%s776_s7 + $0x8] sm:$0xff] }
   0x8   :  { %553 = vmatprep.subr.bf16.mxu1 %v606_v14  ;;  %v566_v61 = vpack.c.bf16 %v273_v60, %v272_v59  ;;  %v357_v0 = vld [vmem:[%s776_s7 + $0x10] sm:$0xff]  ;;  %v569_v1 = vpack.c.bf16 %v356_v63, %v355_v62  ;;  %v358_v2 = vld [vmem:[%s776_s7 + $0x18] sm:$0xff]  ;;  %v451_v15 = vld [vmem:[%s777_s4] ss:$0 sm:$0xff] }
   0x9   :  { %594 = vset.pattern.permute.xlu1 %v602_v5  ;;  %592 = vset.pattern.permute.xlu0 %v603_v6  ;;  %v572_v3 = vpack.c.bf16 %v358_v2, %v357_v0  ;;  %v360_v5 = vld [vmem:[%s776_s7 + $0x28] sm:$0xff]  ;;  %v452_v21 = vld [vmem:[%s778_s6] ss:$0 sm:$0xff] }
   0xa   :  { %70 = vperm.xlu1 %594, %v40_v4   ;;  %58 = vperm.xlu0 %592, %v40_v4  }
   0xb   :  { %549 = vmatpush3.bf16.msra.mxu0 %v548_v19  ;;  %555 = vmatpush3.bf16.msra.mxu1 %v554_v22  ;;  %v94_v9 = vld [vmem:[#allocation2] sm:$0xff]  ;;  %v362_v19 = vld [vmem:[%s776_s7 + $0x38] sm:$0xff] }
   0xc   :  { %556 = vmatprep.subr.bf16.mxu0 %v606_v14  ;;  %568 = vmatprep.subr.bf16.mxu1 %v606_v14 }
   0xe   :  { %595 = vset.pattern.permute.xlu1 %v604_v7  ;;  %596 = vset.pattern.permute.xlu0 %v605_v8 }
   0xf   :  { %76 = vperm.xlu1 %595, %v40_v4   ;;  %82 = vperm.xlu0 %596, %v40_v4  }
  0x13   :  { %597 = vset.pattern.permute.xlu1 %v607_v16  ;;  %599 = vset.pattern.permute.xlu0 %v607_v16 }
  0x14   :  { %88 = vperm.xlu1 %597, %v40_v4  }
  0x18   :  { %598 = vset.pattern.permute.xlu1 %v608_v23 }
  0x19   :  { %47 = vperm.xlu1 %598, %v40_v4   ;;  %v359_v4 = vld [vmem:[%s776_s7 + $0x20] sm:$0xff] }
  0x1a   :  { %v575_v6 = vpack.c.bf16 %v360_v5, %v359_v4 }
  0x84   :  { %v65_v27 = vpop.permute.xlu1 %64  ;;  %v54_v28 = vpop.permute.xlu0 %53 }
  0x85   :  { %vm55_vm1 = vcmp.eq.s32.totalorder %v54_v28, %v42_v26  ;;  %vm66_vm2 = vcmp.eq.s32.totalorder %v65_v27, %v42_v26 }
  0x86   :  { %v56_v31 = vsel %vm55_vm1, 1, %v608_v23  ;;  %v67_v34 = vsel %vm66_vm2, 1, %v608_v23 }
  0x89   :  { %v71_v29 = vpop.permute.xlu1 %70  ;;  %v59_v30 = vpop.permute.xlu0 %58 }
  0x8a   :  { %vm60_vm3 = vcmp.eq.s32.totalorder %v59_v30, %v42_v26  ;;  %vm72_vm4 = vcmp.eq.s32.totalorder %v71_v29, %v42_v26 }
  0x8b   :  { %v61_v32 = vsel %vm60_vm3, 1, %v608_v23  ;;  %v73_v38 = vsel %vm72_vm4, 1, %v608_v23 }
  0x8c   :  { %v62_v33 = vadd.s32 %v61_v32, %v56_v31 }
  0x8e   :  { %v68_v35 = vadd.s32 %v67_v34, %v62_v33  ;;  %v77_v36 = vpop.permute.xlu1 %76  ;;  %v83_v37 = vpop.permute.xlu0 %82 }
  0x8f   :  { %vm78_vm5 = vcmp.eq.s32.totalorder %v77_v36, %v42_v26  ;;  %vm84_vm6 = vcmp.eq.s32.totalorder %v83_v37, %v42_v26 }
  0x90   :  { %v74_v39 = vadd.s32 %v73_v38, %v68_v35  ;;  %v79_v40 = vsel %vm78_vm5, 1, %v608_v23  ;;  %v85_v41 = vsel %vm84_vm6, 1, %v608_v23 }
  0x92   :  { %v80_v42 = vadd.s32 %v79_v40, %v74_v39 }
  0x93   :  { %v89_v43 = vpop.permute.xlu1 %88 }
  0x94   :  { %v86_v44 = vadd.s32 %v85_v41, %v80_v42  ;;  %vm90_vm7 = vcmp.eq.s32.totalorder %v89_v43, %v42_v26 }
  0x95   :  { %v91_v45 = vsel %vm90_vm7, 1, %v608_v23 }
  0x96   :  { %v92_v46 = vadd.s32 %v91_v45, %v86_v44 }
  0x98   :  { %v93_v47 = vcvt.s32.f32 %v92_v46  ;;  %v48_v48 = vpop.permute.xlu1 %47 }
  0x99   :  { %vm49_vm9 = vcmp.eq.s32.totalorder %v48_v48, %v42_v26  ;;  %v454_v26 = vld [vmem:[%s779_s8] ss:$0 sm:$0xff] }
  0x9a   :  { %v448_v49 = vsel %vm49_vm9, 1.0, %v610_v24  ;;  %493 = vmatmul.mubr.msk.f32.vlgmr.msra.gmra.mrb[0].mxu0 %vm103_vm8, %v93_v47 }
  0x9b   :  { %504 = vmatmul.mubr.msk.f32.vlgmr.msra.gmra.mrb[0].mxu1 %vm103_vm8, %v448_v49  ;;  %522 = vmatprep.mubr.msk.f32.mxu0 %vm609_vm0, %v610_v24 }
  0x9c   :  { %541 = vmatprep.mubr.msk.f32.mxu1 %vm609_vm0, %v610_v24  ;;  %558 = vmatpush3.bf16.msra.mxu0 %v557_v52 }
  0x9d   :  { %559 = vmatprep.subr.bf16.mxu0 %v606_v14  ;;  %570 = vmatpush3.bf16.msra.mxu1 %v569_v1 }
  0x9e   :  { %571 = vmatprep.subr.bf16.mxu1 %v606_v14 }
  0xa0   :  { %561 = vmatpush3.bf16.msra.mxu0 %v560_v55 }
  0xa1   :  { %562 = vmatprep.subr.bf16.mxu0 %v606_v14  ;;  %573 = vmatpush3.bf16.msra.mxu1 %v572_v3 }
  0xa2   :  { %574 = vmatprep.subr.bf16.mxu1 %v606_v14 }
  0xa4   :  { %564 = vmatpush3.bf16.msra.mxu0 %v563_v58 }
  0xa5   :  { %565 = vmatprep.subr.bf16.mxu0 %v606_v14  ;;  %576 = vmatpush3.bf16.msra.mxu1 %v575_v6 }
  0xa6   :  { %577 = vmatprep.subr.bf16.mxu1 %v606_v14  ;;  %v361_v14 = vld [vmem:[%s776_s7 + $0x30] sm:$0xff] }
  0xa7   :  { %v578_v20 = vpack.c.bf16 %v362_v19, %v361_v14 }
  0xa8   :  { %567 = vmatpush3.bf16.msra.mxu0 %v566_v61 }
  0xa9   :  { %579 = vmatpush3.bf16.msra.mxu1 %v578_v20 }
 0x16d   :  { %v173_v7 = vpop.f32.mrb[0].mxu0 }
 0x16e   :  { %v494_v8 = vpop.f32.mrb[1].mxu0  ;;  %v246_v10 = vpop.f32.mrb[0].mxu1 }
 0x16f   :  { %v247_v11 = vadd.f32 %v246_v10, %v173_v7  ;;  %v505_v12 = vpop.f32.mrb[1].mxu1 }
 0x171   :  { %v250_v13 = vadd.f32 %v247_v11, %v94_v9 }
 0x173   :  { %252 = vst.msk [vmem:[#allocation2] sm:$0xff] %vm36_vm10, %v250_v13 }
 0x17a   :  { %v256_v16 = vld [vmem:[#allocation2] sm:$0xff] }
 0x17b   :  { %v264_v17 = vadd.f32 %v451_v15, %v256_v16 }
 0x17d   :  { %v265_v18 = vmax.f32 %v264_v17, 0.0 }
 0x17f   :  { %523 = vmatmul.mubr.msk.f32.vlgmr.msra.gmra.mrb[2].mxu0 %vm36_vm10, %v265_v18 }
 0x252   :  { %v350_v22 = vpop.f32.mrb[2].mxu0 }
 0x253   :  { %v351_v23 = vadd.f32 %v452_v21, %v350_v22  ;;  %v524_v24 = vpop.f32.mrb[3].mxu0 }
 0x255   :  { %v354_v25 = vmax.f32 %v351_v23, 0.0 }
 0x257   :  { %542 = vmatmul.mubr.msk.f32.vlgmr.msra.gmra.mrb[2].mxu1 %vm36_vm10, %v354_v25 }
 0x32a   :  { %v439_v27 = vpop.f32.mrb[2].mxu1 }
 0x32b   :  { %v440_v28 = vadd.f32 %v454_v26, %v439_v27  ;;  %v543_v29 = vpop.f32.mrb[3].mxu1 }
 0x32d   :  { %443 = vst [vmem:[%s780_s9] sm:$0xff] %v440_v28 }

</bundles_post_ra>
